<compile_context>
chip_gen: v5e
topology: v5e:2x2
jax: 0.10.0
libtpu: 0.0.40
codegen_flags: <defaults>
</compile_context>

<pallas_src>
import jax
import jax.numpy as jnp
from jax import lax
from jax.experimental import pallas as pl
from jax.experimental.pallas import tpu as pltpu


def _round_up(x, m):
    return ((x + m - 1) // m) * m


# ---------------------------------------------------------------------------
# Kernel 1: h2 = (hidden_state @ W_hs^T + b_hs) * sequence_mask   (all B rows)
# ---------------------------------------------------------------------------
def _hs_kernel(hs_ref, mask_ref, ws_ref, bs_ref, h2_ref, acc_ref):
    k = pl.program_id(2)

    @pl.when(k == 0)
    def _():
        acc_ref[...] = jnp.zeros_like(acc_ref)

    # hs_ref: (bm, tk); ws_ref: (tn, tk) in PyTorch (out, in) layout
    # -> contract both on their last (input) dim, i.e. A @ B^T.
    acc_ref[...] += lax.dot_general(
        hs_ref[...], ws_ref[...],
        dimension_numbers=(((1,), (1,)), ((), ())),
        preferred_element_type=jnp.float32)

    @pl.when(k == pl.num_programs(2) - 1)
    def _():
        h2 = (acc_ref[...] + bs_ref[...]) * mask_ref[...]
        h2_ref[...] = h2.astype(h2_ref.dtype)


# ---------------------------------------------------------------------------
# Kernel 2: out = tanh(history @ W_hist^T + b_hist + h2[b])   (tiled M/N/K)
# ---------------------------------------------------------------------------
def _hist_kernel(hist_ref, h2_ref, wh_ref, bh_ref, o_ref, acc_ref):
    k = pl.program_id(3)

    @pl.when(k == 0)
    def _():
        acc_ref[...] = jnp.zeros_like(acc_ref)

    # hist_ref: (1, th, tk); wh_ref: (tn, tk) -> contract on input dim.
    acc_ref[...] += lax.dot_general(
        hist_ref[0], wh_ref[...],
        dimension_numbers=(((1,), (1,)), ((), ())),
        preferred_element_type=jnp.float32)

    @pl.when(k == pl.num_programs(3) - 1)
    def _():
        out = jnp.tanh(acc_ref[...] + bh_ref[...] + h2_ref[...])  # h2 bcast over th
        o_ref[0] = out.astype(o_ref.dtype)


# ---------------------------------------------------------------------------
# Wrapper
# ---------------------------------------------------------------------------
def history_mlp(history, hidden_state, sequence_mask, w_hist, b_hist, w_hs, b_hs,
                *, tile_h=256, tile_n=256, tile_k=512):
    """history: (B, H, nx); hidden_state: (B, nx); sequence_mask: (B, 1).
    w_*: (nx, nx) PyTorch convention (out, in); b_*: (nx,)."""
    B, H, nx = history.shape
    out_dtype = history.dtype

    # ---- lane/sublane friendly padded sizes ----
    nxp = _round_up(nx, 128)

    tn = min(tile_n, nxp)
    while nxp % tn:
        tn -= 128
    tk = min(tile_k, nxp)
    while nxp % tk:
        tk -= 128

    if _round_up(H, 8) <= tile_h:
        th = _round_up(H, 8)
        Hp = th
    else:
        th = tile_h                      # multiple of 8
        Hp = _round_up(H, th)

    if B <= 256:
        bm, Bp = B, B                    # full-dim block is always legal
    else:
        bm, Bp = 256, _round_up(B, 256)

    # ---- zero-pad inputs / params to tile-friendly shapes ----
    hist_p = jnp.pad(history, ((0, 0), (0, Hp - H), (0, nxp - nx)))
    hs_p = jnp.pad(hidden_state, ((0, Bp - B), (0, nxp - nx)))
    mask_p = jnp.pad(jnp.asarray(sequence_mask, history.dtype), ((0, Bp - B), (0, 0)))
    wh_p = jnp.pad(jnp.asarray(w_hist), ((0, nxp - nx), (0, nxp - nx)))
    ws_p = jnp.pad(jnp.asarray(w_hs), ((0, nxp - nx), (0, nxp - nx)))
    bh_p = jnp.pad(jnp.asarray(b_hist), (0, nxp - nx)).reshape(1, nxp)
    bs_p = jnp.pad(jnp.asarray(b_hs), (0, nxp - nx)).reshape(1, nxp)

    # ---- phase 1: h2 for all batch rows in one batched matmul ----
    h2 = pl.pallas_call(
        _hs_kernel,
        out_shape=jax.ShapeDtypeStruct((Bp, nxp), jnp.float32),
        grid_spec=pltpu.PrefetchScalarGridSpec(
            num_scalar_prefetch=0,
            grid=(Bp // bm, nxp // tn, nxp // tk),
            in_specs=[
                pl.BlockSpec((bm, tk), lambda i, n, k: (i, k)),   # hidden_state
                pl.BlockSpec((bm, 1),  lambda i, n, k: (i, 0)),   # sequence_mask
                pl.BlockSpec((tn, tk), lambda i, n, k: (n, k)),   # W_hs (out, in)
                pl.BlockSpec((1, tn),  lambda i, n, k: (0, n)),   # b_hs
            ],
            out_specs=pl.BlockSpec((bm, tn), lambda i, n, k: (i, n)),
            scratch_shapes=[pltpu.VMEM((bm, tn), jnp.float32)],
        ),
        compiler_params=pltpu.CompilerParams(
            dimension_semantics=("parallel", "parallel", "arbitrary")),
    )(hs_p, mask_p, ws_p, bs_p)

    # ---- phase 2: tiled history matmul + bias + h2 + tanh ----
    out_p = pl.pallas_call(
        _hist_kernel,
        out_shape=jax.ShapeDtypeStruct((B, Hp, nxp), out_dtype),
        grid_spec=pltpu.PrefetchScalarGridSpec(
            num_scalar_prefetch=0,
            grid=(B, Hp // th, nxp // tn, nxp // tk),
            in_specs=[
                pl.BlockSpec((1, th, tk), lambda b, t, n, k: (b, t, k)),  # history
                pl.BlockSpec((1, tn),     lambda b, t, n, k: (b, n)),     # h2 row b
                pl.BlockSpec((tn, tk),    lambda b, t, n, k: (n, k)),     # W_hist
                pl.BlockSpec((1, tn),     lambda b, t, n, k: (0, n)),     # b_hist
            ],
            out_specs=pl.BlockSpec((1, th, tn), lambda b, t, n, k: (b, t, n)),
            scratch_shapes=[pltpu.VMEM((th, tn), jnp.float32)],
        ),
        compiler_params=pltpu.CompilerParams(
            dimension_semantics=("parallel", "parallel", "parallel", "arbitrary")),
    )(hist_p, h2, wh_p, bh_p)

    return out_p[:, :H, :nx]


# ---------------------------------------------------------------------------
# Pure-JAX reference
# ---------------------------------------------------------------------------
def history_mlp_ref(history, hidden_state, sequence_mask, w_hist, b_hist, w_hs, b_hs):
    h1 = jnp.einsum("bhk,nk->bhn", history, w_hist, precision="highest") + b_hist
    h2 = jnp.einsum("bk,nk->bn", hidden_state, w_hs, precision="highest") + b_hs
    h2 = h2 * sequence_mask
    return jnp.tanh(h1 + h2[:, None, :])


if __name__ == "__main__":
    B, H, nx = 2, 8, 32          # batch, history length, n_embd
    initializer_range = 0.02

    key = jax.random.PRNGKey(0)
    k1, k2, k3, k4, k5 = jax.random.split(key, 5)

    history = jax.random.normal(k1, (B, H, nx), dtype=jnp.float32)
    hidden_state = jax.random.normal(k2, (B, nx), dtype=jnp.float32)
    sequence_mask = (jax.random.uniform(k3, (B, 1)) > 0.5).astype(jnp.float32)

    # Deterministic parameter init mirroring _init_weights: normal(0, init_range), zero bias.
    w_hist = initializer_range * jax.random.normal(k4, (nx, nx), dtype=jnp.float32)
    b_hist = jnp.zeros((nx,), dtype=jnp.float32)
    w_hs = initializer_range * jax.random.normal(k5, (nx, nx), dtype=jnp.float32)
    b_hs = jnp.zeros((nx,), dtype=jnp.float32)

    out = history_mlp(history, hidden_state, sequence_mask, w_hist, b_hist, w_hs, b_hs)
    out = jax.block_until_ready(out)

    ref = history_mlp_ref(history, hidden_state, sequence_mask, w_hist, b_hist, w_hs, b_hs)
    assert out.shape == (B, H, nx)
    assert jnp.allclose(out, ref, atol=1e-5, rtol=1e-5), "mismatch vs reference"

    print("KERNEL_OK")
</pallas_src>

<mosaic_0001>
module attributes {stable_mosaic.version = 11 : i64} {
  func.func @_hs_kernel(%arg0: i32, %arg1: i32, %arg2: i32, %arg3: memref<2x128xf32, #tpu.memory_space<vmem>>, %arg4: memref<2x1xf32, #tpu.memory_space<vmem>>, %arg5: memref<128x128xf32, #tpu.memory_space<vmem>>, %arg6: memref<1x128xf32, #tpu.memory_space<vmem>>, %arg7: memref<2x128xf32, #tpu.memory_space<vmem>>, %arg8: memref<2x128xf32, #tpu.memory_space<vmem>>) attributes {dimension_semantics = [#tpu.dimension_semantics<parallel>, #tpu.dimension_semantics<parallel>, #tpu.dimension_semantics<arbitrary>], iteration_bounds = array<i64: 1, 1, 1>, scalar_prefetch = 0 : i64, scratch_operands = 1 : i64, tpu.core_type = #tpu.core_type<tc>, window_params = [{transform_indices = @transform_0, window_bounds = array<i64: 2, 128>}, {transform_indices = @transform_1, window_bounds = array<i64: 2, 1>}, {transform_indices = @transform_2, window_bounds = array<i64: 128, 128>}, {transform_indices = @transform_3, window_bounds = array<i64: 1, 128>}, {transform_indices = @transform_4, window_bounds = array<i64: 2, 128>}]} {
    %c0_i32 = arith.constant 0 : i32
    %0 = arith.cmpi eq, %arg2, %c0_i32 : i32
    %1 = arith.extui %0 : i1 to i32
    %c0_i32_0 = arith.constant 0 : i32
    %2 = arith.cmpi ne, %1, %c0_i32_0 : i32
    scf.if %2 {
      %cst_10 = arith.constant 0.000000e+00 : f32
      %12 = vector.broadcast %cst_10 : f32 to vector<2x128xf32>
      %c0_11 = arith.constant 0 : index
      %c0_12 = arith.constant 0 : index
      %13 = vector.load %arg8[%c0_11, %c0_12] : memref<2x128xf32, #tpu.memory_space<vmem>>, vector<2x128xf32>
      tpu.vector_store %arg8[%c0_11, %c0_12], %12 {strides = array<i32>} : memref<2x128xf32, #tpu.memory_space<vmem>>, vector<2x128xf32>,
    } else {
    }
    %c0 = arith.constant 0 : index
    %c0_1 = arith.constant 0 : index
    %3 = vector.load %arg8[%c0, %c0_1] : memref<2x128xf32, #tpu.memory_space<vmem>>, vector<2x128xf32>
    %c0_2 = arith.constant 0 : index
    %c0_3 = arith.constant 0 : index
    %4 = vector.load %arg3[%c0_2, %c0_3] : memref<2x128xf32, #tpu.memory_space<vmem>>, vector<2x128xf32>
    %c0_4 = arith.constant 0 : index
    %c0_5 = arith.constant 0 : index
    %5 = vector.load %arg5[%c0_4, %c0_5] : memref<128x128xf32, #tpu.memory_space<vmem>>, vector<128x128xf32>
    %cst = arith.constant dense<0.000000e+00> : vector<2x128xf32>
    %6 = tpu.matmul %4, %5, %cst {dimension_numbers = #tpu.dot_dimension_numbers<[1], [1], [0], [0], [0, 0, 1, 0], [], []>} : vector<2x128xf32>, vector<128x128xf32>, vector<2x128xf32> -> vector<2x128xf32>
    %7 = arith.addf %3, %6 : vector<2x128xf32>
    %c0_6 = arith.constant 0 : index
    %c0_7 = arith.constant 0 : index
    %8 = vector.load %arg8[%c0_6, %c0_7] : memref<2x128xf32, #tpu.memory_space<vmem>>, vector<2x128xf32>
    tpu.vector_store %arg8[%c0_6, %c0_7], %7 {strides = array<i32>} : memref<2x128xf32, #tpu.memory_space<vmem>>, vector<2x128xf32>,
    %c0_i32_8 = arith.constant 0 : i32
    %9 = arith.cmpi eq, %arg2, %c0_i32_8 : i32
    %10 = arith.extui %9 : i1 to i32
    %c0_i32_9 = arith.constant 0 : i32
    %11 = arith.cmpi ne, %10, %c0_i32_9 : i32
    scf.if %11 {
      %c0_10 = arith.constant 0 : index
      %c0_11 = arith.constant 0 : index
      %12 = vector.load %arg8[%c0_10, %c0_11] : memref<2x128xf32, #tpu.memory_space<vmem>>, vector<2x128xf32>
      %c0_12 = arith.constant 0 : index
      %c0_13 = arith.constant 0 : index
      %13 = vector.load %arg6[%c0_12, %c0_13] : memref<1x128xf32, #tpu.memory_space<vmem>>, vector<1x128xf32>
      %14 = vector.broadcast %13 : vector<1x128xf32> to vector<2x128xf32>
      %15 = arith.addf %12, %14 : vector<2x128xf32>
      %c0_14 = arith.constant 0 : index
      %c0_15 = arith.constant 0 : index
      %16 = vector.load %arg4[%c0_14, %c0_15] : memref<2x1xf32, #tpu.memory_space<vmem>>, vector<2x1xf32>
      %17 = vector.broadcast %16 : vector<2x1xf32> to vector<2x128xf32>
      %18 = arith.mulf %15, %17 : vector<2x128xf32>
      %c0_16 = arith.constant 0 : index
      %c0_17 = arith.constant 0 : index
      %19 = vector.load %arg7[%c0_16, %c0_17] : memref<2x128xf32, #tpu.memory_space<vmem>>, vector<2x128xf32>
      tpu.vector_store %arg7[%c0_16, %c0_17], %18 {strides = array<i32>} : memref<2x128xf32, #tpu.memory_space<vmem>>, vector<2x128xf32>,
    } else {
    }
    return
  }
  func.func @transform_0(%arg0: i32, %arg1: i32, %arg2: i32) -> (i32, i32) {
    %c0_i32 = arith.constant 0 : i32
    return %arg0, %arg2 : i32, i32
  }
  func.func @transform_1(%arg0: i32, %arg1: i32, %arg2: i32) -> (i32, i32) {
    %c0_i32 = arith.constant 0 : i32
    %c0_i32_0 = arith.constant 0 : i32
    return %arg0, %c0_i32 : i32, i32
  }
  func.func @transform_2(%arg0: i32, %arg1: i32, %arg2: i32) -> (i32, i32) {
    %c0_i32 = arith.constant 0 : i32
    return %arg1, %arg2 : i32, i32
  }
  func.func @transform_3(%arg0: i32, %arg1: i32, %arg2: i32) -> (i32, i32) {
    %c0_i32 = arith.constant 0 : i32
    %c0_i32_0 = arith.constant 0 : i32
    return %c0_i32, %arg1 : i32, i32
  }
  func.func @transform_4(%arg0: i32, %arg1: i32, %arg2: i32) -> (i32, i32) {
    %c0_i32 = arith.constant 0 : i32
    return %arg0, %arg1 : i32, i32
  }
}

</mosaic_0001>

<bundles_post_ra>
// kernel: tpu_custom_call.1
= control target key start
LH: loop header
LB: loop body
LE: loop exit
PB: predicated region body
PF: predicated region fallthrough
CT: control target
= control target key end

     0   :  { %9 = vsyncpa [#allocation4], 0  ;;  %s219_s0 = inlined_call_operand.vmem [shape: f32[2,128], index: 0, kind: input, shape index: {}]   ;;  %s220_s1 = inlined_call_operand.vmem [shape: f32[2,1], index: 1, kind: input, shape index: {}]   ;;  %s221_s2 = inlined_call_operand.hbm [shape: f32[128,128], index: 2, kind: input, shape index: {}]   ;;  %s222_s3 = inlined_call_operand.vmem [shape: f32[1,128], index: 3, kind: input, shape index: {}]   ;;  %s223_s4 = inlined_call_operand.hbm [shape: f32[2,128], index: 4, kind: output, shape index: {}]  }
   0x1   :  { %10 = vsyncpa [#allocation5], 0  ;;  %s19_s17 = sshll.u32 %s221_s2, 4  ;;  %s173_s18 = smov [#allocation3]   ;;  %s20_s17 = int_to_ptr.hbm [resolvable:$true] %s19_s17 }
   0x2   :  { %s21_s19 = sshll.u32 %s173_s18, 4  ;;  %s174_s20 = smov 128   ;;  %s22_s19 = int_to_ptr.vmem [resolvable:$true] %s21_s19 }
   0x3   :  { %s175_s21 = smov 8  }
   0x4   :  { %27 = dma.hbm_to_vmem [thread:$0]  %s20_s17, 2048, %s22_s19, [#allocation4], %s174_s20, %s174_s20, %s175_s21  }
   0x5   :  { %169 = dma.done.wait [#allocation4], 2048  }
   0x6   :  { %170 = vsyncadd [#allocation4], 4294965248  ;;  %v56_v0 = vld [vmem:[#allocation3 + $0x78] sm:$0xff]  ;;  %v55_v1 = vld [vmem:[#allocation3 + $0x70] sm:$0xff]  ;;  %v176_v10 = vmov 0   ;;  %v177_v11 = vmov 0.0  }
   0x7   :  { %57 = vmatpush.xpose.msra.mxu0 %v56_v0  ;;  %v54_v2 = vld [vmem:[#allocation3 + $0x68] sm:$0xff]  ;;  %v53_v3 = vld [vmem:[#allocation3 + $0x60] sm:$0xff]  ;;  %v52_v4 = vld [vmem:[#allocation3 + $0x58] sm:$0xff]  ;;  %119 = vset.pattern.permute.xlu0 %v176_v10  ;;  %38 = vst [vmem:[#allocation2] sm:$0x3] %v177_v11  ;;  %s178_s26 = smov [#allocation6]  }
   0x8   :  { %v51_v5 = vld [vmem:[#allocation3 + $0x50] sm:$0xff]  ;;  %v50_v6 = vld [vmem:[#allocation3 + $0x48] sm:$0xff]  ;;  %v49_v7 = vld [vmem:[#allocation3 + $0x40] sm:$0xff]  ;;  %s101_s27 = sshll.u32 %s178_s26, 4  ;;  %s103_s30 = sshll.u32 %s223_s4, 4  ;;  %s102_s27 = int_to_ptr.vmem [resolvable:$true] %s101_s27  ;;  %s104_s30 = int_to_ptr.hbm [resolvable:$true] %s103_s30 }
   0x9   :  { %v48_v8 = vld [vmem:[#allocation3 + $0x38] sm:$0xff]  ;;  %v47_v12 = vld [vmem:[#allocation3 + $0x30] sm:$0xff]  ;;  %v46_v13 = vld [vmem:[#allocation3 + $0x28] sm:$0xff] }
   0xa   :  { %v88_v9 = vld [vmem:[%s220_s1] sm:$0x3]  ;;  %v45_v14 = vld [vmem:[#allocation3 + $0x20] sm:$0xff]  ;;  %v43_v16 = vld [vmem:[#allocation3 + $0x10] sm:$0xff] }
   0xb   :  { %58 = vmatpush.xpose.msra.mxu0 %v55_v1  ;;  %91 = vperm.xlu0 %119, %v88_v9   ;;  %v44_v15 = vld [vmem:[#allocation3 + $0x18] sm:$0xff]  ;;  %v42_v17 = vld [vmem:[#allocation3 + $0x8] sm:$0xff]  ;;  %v41_v18 = vld [vmem:[#allocation3] sm:$0xff] }
   0xc   :  { %v40_v19 = vld [vmem:[%s219_s0] sm:$0x3] }
   0xd   :  { %v120_v23 = vld [vmem:[%s222_s3] ss:$0 sm:$0xff] }
   0xe   :  { %v39_v20 = vld [vmem:[#allocation2] sm:$0x3] }
   0xf   :  { %59 = vmatpush.xpose.msra.mxu0 %v54_v2 }
  0x13   :  { %60 = vmatpush.xpose.msra.mxu0 %v53_v3 }
  0x17   :  { %61 = vmatpush.xpose.msra.mxu0 %v52_v4 }
  0x1b   :  { %62 = vmatpush.xpose.msra.mxu0 %v51_v5 }
  0x1f   :  { %63 = vmatpush.xpose.msra.mxu0 %v50_v6 }
  0x23   :  { %64 = vmatpush.xpose.msra.mxu0 %v49_v7 }
  0x27   :  { %65 = vmatpush.xpose.msra.mxu0 %v48_v8 }
  0x2b   :  { %66 = vmatpush.xpose.msra.mxu0 %v47_v12 }
  0x2f   :  { %67 = vmatpush.xpose.msra.mxu0 %v46_v13 }
  0x33   :  { %68 = vmatpush.xpose.msra.mxu0 %v45_v14 }
  0x37   :  { %69 = vmatpush.xpose.msra.mxu0 %v44_v15 }
  0x3b   :  { %70 = vmatpush.xpose.msra.mxu0 %v43_v16 }
  0x3f   :  { %71 = vmatpush.xpose.msra.mxu0 %v42_v17 }
  0x43   :  { %72 = vmatpush.xpose.msra.mxu0 %v41_v18 }
  0x46   :  { %73 = vmatmul.f32.vlgmr.msra.gmra.mxu0 %v40_v19 }
  0x7d   :  { %v92_v24 = vpop.permute.xlu0 %91 }
  0xc3   :  { %v74_v21 = vpop.f32.mrf.mxu0 }
  0xc4   :  { %v77_v22 = vadd.f32 %v74_v21, %v39_v20 }
  0xc6   :  { %78 = vst [vmem:[#allocation2] sm:$0x3] %v77_v22 }
  0xcd   :  { %v82_v25 = vld [vmem:[#allocation2] sm:$0x3] }
  0xce   :  { %v87_v26 = vadd.f32 %v120_v23, %v82_v25 }
  0xd0   :  { %v94_v27 = vmul.f32 %v92_v24, %v87_v26 }
  0xd2   :  { %95 = vst [vmem:[#allocation6] sm:$0x3] %v94_v27 }
  0xd3   :  { %106 = dma.vmem_to_hbm [thread:$0]  %s102_s27, 32, %s104_s30, [#allocation5]  }
  0xd4   :  { %171 = dma.done.wait [#allocation5], 32  }
  0xd5   :  { %172 = vsyncadd [#allocation5], 4294967264 }
  0xd6   :  { %111 = vsyncpa [#allocation4], 1 }
  0xd7   :  { %112 = vsyncpa [#allocation5], 1 }

</bundles_post_ra>
